<compile_context>
chip_gen: v7x
topology: tpu7x:2x2x1
jax: 0.10.0
libtpu: 0.0.40
codegen_flags: <defaults>
</compile_context>

<pallas_src>
import functools

import jax
import jax.numpy as jnp
from jax.experimental import pallas as pl
from jax.experimental.pallas import tpu as pltpu


def _qcat_dequant_kernel(a_ref, b_ref, o_ref, *,
                         n_batch, ca, cb,
                         k_a, zp_a, k_b, zp_b, scale_out, zp_out):
    """Fused requantize(+clamp)+dequantize, writing the concatenated layout.

    Folded math (exactly equal to dequant -> quantized.cat -> dequant):
        out = clip(round((q - zp_in) * (scale_in/scale_out)),
                   -zp_out, 255 - zp_out) * scale_out
    """
    lo = jnp.float32(-zp_out)
    hi = jnp.float32(255.0 - zp_out)
    s_out = jnp.float32(scale_out)

    # Two big vectorized compute chains over the full (N*C, H*W) operands.
    ya = jnp.clip(
        jnp.round((a_ref[...].astype(jnp.float32) - jnp.float32(zp_a))
                  * jnp.float32(k_a)),
        lo, hi) * s_out
    yb = jnp.clip(
        jnp.round((b_ref[...].astype(jnp.float32) - jnp.float32(zp_b))
                  * jnp.float32(k_b)),
        lo, hi) * s_out

    # Scatter the per-batch row blocks into the concatenated output layout.
    # Static (trace-time) loop; N is tiny.  Stores are lane-dense (width HW).
    c_out = ca + cb
    for i in range(n_batch):
        o_ref[i * c_out: i * c_out + ca, :] = ya[i * ca:(i + 1) * ca, :]
        o_ref[i * c_out + ca:(i + 1) * c_out, :] = yb[i * cb:(i + 1) * cb, :]


def quantized_cat_dequant(a_q, b_q, *,
                          scale_a, zp_a, scale_b, zp_b,
                          scale, zero_point, dimension=1):
    """a_q, b_q: uint8 NCHW quantized tensors. Returns float32 NCHW concat."""
    assert dimension == 1, "this kernel implements channel (dim=1) concat"
    N, Ca, H, W = a_q.shape
    Nb, Cb, Hb, Wb = b_q.shape
    assert (N, H, W) == (Nb, Hb, Wb)
    HW = H * W

    # Metadata-only reshapes: lane-dense (multiple of 128) last dim.
    a2 = a_q.reshape(N * Ca, HW)
    b2 = b_q.reshape(N * Cb, HW)

    kernel = functools.partial(
        _qcat_dequant_kernel,
        n_batch=N, ca=Ca, cb=Cb,
        k_a=float(scale_a) / float(scale), zp_a=float(zp_a),
        k_b=float(scale_b) / float(scale), zp_b=float(zp_b),
        scale_out=float(scale), zp_out=float(zero_point),
    )

    vmem = pl.BlockSpec(memory_space=pltpu.MemorySpace.VMEM)
    out2 = pl.pallas_call(
        kernel,
        in_specs=[vmem, vmem],
        out_specs=vmem,
        out_shape=jax.ShapeDtypeStruct((N * (Ca + Cb), HW), jnp.float32),
    )(a2, b2)

    # Row-major (N*(Ca+Cb), H*W) == (N, Ca+Cb, H, W): metadata-only reshape,
    # no extra HBM pass and no extra op launch (unlike the previous concat).
    return out2.reshape(N, Ca + Cb, H, W)


if __name__ == "__main__":
    # Module "parameters" (from __init__): dimension, scale, zero_point.
    dimension = 1
    scale = 0.05
    zero_point = 10

    # Per-input quantization params (a/b arrive as quantized tensors in torch).
    scale_a, zp_a = 0.02, 5
    scale_b, zp_b = 0.03, 7

    key = jax.random.PRNGKey(0)
    k1, k2 = jax.random.split(key)
    N, C, H, W = 2, 4, 16, 16
    a_q = jax.random.randint(k1, (N, C, H, W), 0, 256,
                             dtype=jnp.int32).astype(jnp.uint8)
    b_q = jax.random.randint(k2, (N, C, H, W), 0, 256,
                             dtype=jnp.int32).astype(jnp.uint8)

    out = quantized_cat_dequant(
        a_q, b_q,
        scale_a=scale_a, zp_a=zp_a,
        scale_b=scale_b, zp_b=zp_b,
        scale=scale, zero_point=zero_point,
        dimension=dimension,
    )
    jax.block_until_ready(out)

    # Reference 1: same folded formulation (bit-exact vs. the kernel).
    def _ref_folded(q, s_in, z_in):
        k = jnp.float32(float(s_in) / float(scale))
        r = jnp.round((q.astype(jnp.float32) - jnp.float32(z_in)) * k)
        return jnp.clip(r, -zero_point, 255 - zero_point) * jnp.float32(scale)

    # Reference 2: faithful torch-style dequant -> round(f/scale) -> clamp -> dequant.
    # Can differ from the folded form by at most one quantization step (exact ties).
    def _ref_torch(q, s_in, z_in):
        f = (q.astype(jnp.float32) - z_in) * s_in
        qo = jnp.clip(jnp.round(f / scale) + zero_point, 0.0, 255.0)
        return (qo - zero_point) * scale

    ref_f = jnp.concatenate(
        [_ref_folded(a_q, scale_a, zp_a), _ref_folded(b_q, scale_b, zp_b)],
        axis=dimension)
    ref_t = jnp.concatenate(
        [_ref_torch(a_q, scale_a, zp_a), _ref_torch(b_q, scale_b, zp_b)],
        axis=dimension)

    assert out.shape == (N, 2 * C, H, W) and out.dtype == jnp.float32
    assert jnp.max(jnp.abs(out - ref_f)) < 1e-6
    assert jnp.max(jnp.abs(out - ref_t)) <= scale + 1e-6

    print("KERNEL_OK")
</pallas_src>

<mosaic_0001>
module attributes {stable_mosaic.version = 11 : i64} {
  func.func @_qcat_dequant_kernel(%arg0: memref<8x256xi8, #tpu.memory_space<vmem>>, %arg1: memref<8x256xi8, #tpu.memory_space<vmem>>, %arg2: memref<16x256xf32, #tpu.memory_space<vmem>>) attributes {dimension_semantics = [], scalar_prefetch = 0 : i64, scratch_operands = 0 : i64, tpu.core_type = #tpu.core_type<tc>} {
    %c0 = arith.constant 0 : index
    %c0_0 = arith.constant 0 : index
    %0 = vector.load %arg0[%c0, %c0_0] : memref<8x256xi8, #tpu.memory_space<vmem>>, vector<8x256xi8>
    %1 = arith.uitofp %0 : vector<8x256xi8> to vector<8x256xf32>
    %cst = arith.constant 5.000000e+00 : f32
    %2 = vector.broadcast %cst : f32 to vector<8x256xf32>
    %3 = arith.subf %1, %2 : vector<8x256xf32>
    %cst_1 = arith.constant 4.000000e-01 : f32
    %4 = vector.broadcast %cst_1 : f32 to vector<8x256xf32>
    %5 = arith.mulf %3, %4 : vector<8x256xf32>
    %6 = math.roundeven %5 : vector<8x256xf32>
    %cst_2 = arith.constant -1.000000e+01 : f32
    %cst_3 = arith.constant 2.450000e+02 : f32
    %7 = vector.broadcast %cst_2 : f32 to vector<8x256xf32>
    %8 = arith.maximumf %7, %6 : vector<8x256xf32>
    %9 = vector.broadcast %cst_3 : f32 to vector<8x256xf32>
    %10 = arith.minimumf %9, %8 : vector<8x256xf32>
    %cst_4 = arith.constant 5.000000e-02 : f32
    %11 = vector.broadcast %cst_4 : f32 to vector<8x256xf32>
    %12 = arith.mulf %10, %11 : vector<8x256xf32>
    %c0_5 = arith.constant 0 : index
    %c0_6 = arith.constant 0 : index
    %13 = vector.load %arg1[%c0_5, %c0_6] : memref<8x256xi8, #tpu.memory_space<vmem>>, vector<8x256xi8>
    %14 = arith.uitofp %13 : vector<8x256xi8> to vector<8x256xf32>
    %cst_7 = arith.constant 7.000000e+00 : f32
    %15 = vector.broadcast %cst_7 : f32 to vector<8x256xf32>
    %16 = arith.subf %14, %15 : vector<8x256xf32>
    %cst_8 = arith.constant 6.000000e-01 : f32
    %17 = vector.broadcast %cst_8 : f32 to vector<8x256xf32>
    %18 = arith.mulf %16, %17 : vector<8x256xf32>
    %19 = math.roundeven %18 : vector<8x256xf32>
    %cst_9 = arith.constant -1.000000e+01 : f32
    %cst_10 = arith.constant 2.450000e+02 : f32
    %20 = vector.broadcast %cst_9 : f32 to vector<8x256xf32>
    %21 = arith.maximumf %20, %19 : vector<8x256xf32>
    %22 = vector.broadcast %cst_10 : f32 to vector<8x256xf32>
    %23 = arith.minimumf %22, %21 : vector<8x256xf32>
    %cst_11 = arith.constant 5.000000e-02 : f32
    %24 = vector.broadcast %cst_11 : f32 to vector<8x256xf32>
    %25 = arith.mulf %23, %24 : vector<8x256xf32>
    %26 = vector.extract_strided_slice %12 {offsets = [0, 0], sizes = [4, 256], strides = [1, 1]} : vector<8x256xf32> to vector<4x256xf32>
    %c0_12 = arith.constant 0 : index
    %c0_13 = arith.constant 0 : index
    %27 = vector.load %arg2[%c0_12, %c0_13] : memref<16x256xf32, #tpu.memory_space<vmem>>, vector<4x256xf32>
    tpu.vector_store %arg2[%c0_12, %c0_13], %26 {strides = array<i32>} : memref<16x256xf32, #tpu.memory_space<vmem>>, vector<4x256xf32>,
    %28 = vector.extract_strided_slice %25 {offsets = [0, 0], sizes = [4, 256], strides = [1, 1]} : vector<8x256xf32> to vector<4x256xf32>
    %c4 = arith.constant 4 : index
    %c0_14 = arith.constant 0 : index
    %29 = vector.load %arg2[%c4, %c0_14] : memref<16x256xf32, #tpu.memory_space<vmem>>, vector<4x256xf32>
    tpu.vector_store %arg2[%c4, %c0_14], %28 {strides = array<i32>} : memref<16x256xf32, #tpu.memory_space<vmem>>, vector<4x256xf32>,
    %30 = vector.extract_strided_slice %12 {offsets = [4, 0], sizes = [4, 256], strides = [1, 1]} : vector<8x256xf32> to vector<4x256xf32>
    %c8 = arith.constant 8 : index
    %c0_15 = arith.constant 0 : index
    %31 = vector.load %arg2[%c8, %c0_15] : memref<16x256xf32, #tpu.memory_space<vmem>>, vector<4x256xf32>
    tpu.vector_store %arg2[%c8, %c0_15], %30 {strides = array<i32>} : memref<16x256xf32, #tpu.memory_space<vmem>>, vector<4x256xf32>,
    %32 = vector.extract_strided_slice %25 {offsets = [4, 0], sizes = [4, 256], strides = [1, 1]} : vector<8x256xf32> to vector<4x256xf32>
    %c12 = arith.constant 12 : index
    %c0_16 = arith.constant 0 : index
    %33 = vector.load %arg2[%c12, %c0_16] : memref<16x256xf32, #tpu.memory_space<vmem>>, vector<4x256xf32>
    tpu.vector_store %arg2[%c12, %c0_16], %32 {strides = array<i32>} : memref<16x256xf32, #tpu.memory_space<vmem>>, vector<4x256xf32>,
    return
  }
}

</mosaic_0001>

<bundles_post_ra>
// kernel: tpu_custom_call.1
= control target key start
LH: loop header
LB: loop body
LE: loop exit
PB: predicated region body
PF: predicated region fallthrough
CT: control target
= control target key end

     0   :  { %7 = vsyncpa [#allocation3], 0  ;;  %s253_s0 = inlined_call_operand.hbm [shape: u8[8,256], index: 0, kind: input, shape index: {}]   ;;  %s254_s1 = inlined_call_operand.hbm [shape: u8[8,256], index: 1, kind: input, shape index: {}]   ;;  %s255_s2 = inlined_call_operand.hbm [shape: f32[16,256], index: 2, kind: output, shape index: {}]  }
   0x1   :  { %8 = vsyncpa [#allocation6], 0 }
   0x2   :  { %9 = vsyncpa [#allocation4], 0  ;;  %s197_s9 = smov [#allocation2]   ;;  %s198_s11 = smov [#allocation5]  }
   0x3   :  { %s16_s10 = sshll.u32 %s197_s9, 4  ;;  %s26_s12 = sshll.u32 %s198_s11, 4  ;;  %s17_s10 = int_to_ptr.vmem [resolvable:$true] %s16_s10  ;;  %s27_s12 = int_to_ptr.vmem [resolvable:$true] %s26_s12 }
   0x4   :  { %s125_s15 = scalar_lea.hbm %s253_s0, 64 }
   0x5   :  { %p126_p0 = scmp.ne.s32.totalorder %s253_s0, %s125_s15  ;;  %p129_p1 = scmp.lt.u32.totalorder %s125_s15, %s253_s0 }
   0x7   :  { %p131_p2 = pnand %p129_p1, %p126_p0 }
   0x9   :  { %134 = shalt.err (!%p131_p2)
}
   0xa   :  { %s135_s20 = scalar_lea.vmem %s17_s10, 64  ;;  %p140_p4 = scmp.lt.s32.totalorder %s17_s10, %s17_s10 }
   0xb   :  { %p136_p3 = scmp.ne.s32.totalorder %s17_s10, %s135_s20  ;;  %p141_p5 = scmp.lt.s32.totalorder %s135_s20, %s135_s20 }
   0xd   :  { %p142_p6 = por %p141_p5, %p140_p4 }
   0xf   :  { %p143_p7 = pnand %p142_p6, %p136_p3 }
  0x11   :  { %146 = shalt.err (!%p143_p7)
}
  0x12   :  { %19 = dma.hbm_to_vmem [thread:$0]  %s253_s0, 64, %s17_s10, [#allocation3]  }
  0x13   :  { %s147_s25 = scalar_lea.hbm %s254_s1, 64 }
  0x14   :  { %p148_p8 = scmp.ne.s32.totalorder %s254_s1, %s147_s25  ;;  %p151_p9 = scmp.lt.u32.totalorder %s147_s25, %s254_s1 }
  0x16   :  { %p153_p10 = pnand %p151_p9, %p148_p8 }
  0x18   :  { %156 = shalt.err (!%p153_p10)
}
  0x19   :  { %s157_s30 = scalar_lea.vmem %s27_s12, 64  ;;  %p162_p12 = scmp.lt.s32.totalorder %s27_s12, %s27_s12 }
  0x1a   :  { %p158_p11 = scmp.ne.s32.totalorder %s27_s12, %s157_s30  ;;  %p163_p13 = scmp.lt.s32.totalorder %s157_s30, %s157_s30 }
  0x1c   :  { %p164_p0 = por %p163_p13, %p162_p12 }
  0x1e   :  { %p165_p1 = pnand %p164_p0, %p158_p11 }
  0x20   :  { %168 = shalt.err (!%p165_p1)
}
  0x21   :  { %29 = dma.hbm_to_vmem [thread:$0]  %s254_s1, 64, %s27_s12, [#allocation6]  }
  0x22   :  { %191 = dma.done.wait [#allocation3], 64  }
  0x23   :  { %192 = vsyncadd [#allocation3], 4294967232 }
  0x24   :  { %193 = dma.done.wait [#allocation6], 64  }
  0x25   :  { %194 = vsyncadd [#allocation6], 4294967232  ;;  %v36_v0 = vld [vmem:[#allocation2] sm:$0xf]  ;;  %v55_v1 = vld [vmem:[#allocation5] sm:$0xf] }
  0x26   :  { %v37_v2 = vunpack.c.0.s8 %v36_v0  ;;  %v38_v3 = vunpack.c.1.s8 %v36_v0  ;;  %v56_v4 = vunpack.c.0.s8 %v55_v1  ;;  %v57_v5 = vunpack.c.1.s8 %v55_v1  ;;  %s199_s1 = smov [#allocation7]  }
  0x27   :  { %s99_s4 = sshll.u32 %s199_s1, 4  ;;  %s100_s4 = int_to_ptr.vmem [resolvable:$true] %s99_s4 }
  0x28   :  { %v39_v6 = vand.u32 255, %v37_v2  ;;  %v40_v7 = vand.u32 255, %v38_v3  ;;  %v58_v8 = vand.u32 255, %v56_v4  ;;  %v59_v9 = vand.u32 255, %v57_v5  ;;  %s169_s5 = scalar_lea.vmem %s100_s4, 512  ;;  %p174_p3 = scmp.lt.s32.totalorder %s100_s4, %s100_s4 }
  0x29   :  { %p170_p2 = scmp.ne.s32.totalorder %s100_s4, %s169_s5  ;;  %p175_p4 = scmp.lt.s32.totalorder %s169_s5, %s169_s5 }
  0x2a   :  { %v41_v10 = vcvt.s32.f32 %v39_v6  ;;  %v42_v11 = vcvt.s32.f32 %v40_v7  ;;  %v60_v12 = vcvt.s32.f32 %v58_v8  ;;  %v61_v13 = vcvt.s32.f32 %v59_v9 }
  0x2b   :  { %p176_p5 = por %p175_p4, %p174_p3 }
  0x2c   :  { %v112_v14 = vadd.f32 -5.0, %v41_v10  ;;  %v113_v15 = vadd.f32 -5.0, %v42_v11  ;;  %v114_v16 = vadd.f32 -7.0, %v60_v12  ;;  %v115_v17 = vadd.f32 -7.0, %v61_v13 }
  0x2d   :  { %p177_p6 = pnand %p176_p5, %p170_p2 }
  0x2e   :  { %v45_v18 = vmul.f32 0.4, %v112_v14  ;;  %v46_v19 = vmul.f32 0.4, %v113_v15  ;;  %v64_v20 = vmul.f32 0.6, %v114_v16 }
  0x2f   :  { %v65_v21 = vmul.f32 0.6, %v115_v17 }
  0x30   :  { %v116_v22 = vround.rtne.f32 %v45_v18  ;;  %v117_v23 = vround.rtne.f32 %v46_v19  ;;  %v118_v24 = vround.rtne.f32 %v64_v20 }
  0x31   :  { %v119_v25 = vround.rtne.f32 %v65_v21 }
  0x32   :  { %v49_v26 = vmax.f32 %v116_v22, -10.0  ;;  %v50_v27 = vmax.f32 %v117_v23, -10.0  ;;  %v68_v28 = vmax.f32 %v118_v24, -10.0 }
  0x33   :  { %v69_v29 = vmax.f32 %v119_v25, -10.0 }
  0x34   :  { %v51_v30 = vmin.f32 %v49_v26, 245.0  ;;  %v52_v31 = vmin.f32 %v50_v27, 245.0  ;;  %v70_v32 = vmin.f32 %v68_v28, 245.0 }
  0x35   :  { %v71_v33 = vmin.f32 %v69_v29, 245.0 }
  0x36   :  { %v53_v34 = vmul.f32 0.05, %v51_v30  ;;  %v54_v35 = vmul.f32 0.05, %v52_v31  ;;  %v72_v36 = vmul.f32 0.05, %v70_v32 }
  0x37   :  { %v73_v37 = vmul.f32 0.05, %v71_v33 }
  0x38   :  { %74 = vst [vmem:[#allocation7] sm:$0xf] %v53_v34  ;;  %75 = vst [vmem:[#allocation7 + $0x8] sm:$0xf] %v54_v35  ;;  %v78_v38 = vrot.slane %v72_v36, 4  ;;  %v86_v39 = vrot.slane %v53_v34, 4 }
  0x39   :  { %92 = vst [vmem:[#allocation7 + $0x10] sm:$0xf0] %v72_v36  ;;  %v87_v40 = vrot.slane %v54_v35, 4  ;;  %v79_v41 = vrot.slane %v73_v37, 4  ;;  %93 = vst [vmem:[#allocation7 + $0x18] sm:$0xf0] %v73_v37 }
  0x3a   :  { %82 = vst [vmem:[#allocation7] sm:$0xf0] %v78_v38  ;;  %90 = vst [vmem:[#allocation7 + $0x10] sm:$0xf] %v86_v39 }
  0x3b   :  { %91 = vst [vmem:[#allocation7 + $0x18] sm:$0xf] %v87_v40  ;;  %83 = vst [vmem:[#allocation7 + $0x8] sm:$0xf0] %v79_v41 }
  0x3c   :  { %180 = shalt.err (!%p177_p6)
}
  0x3d   :  { %s181_s8 = scalar_lea.hbm %s255_s2, 512 }
  0x3e   :  { %p182_p7 = scmp.ne.s32.totalorder %s255_s2, %s181_s8  ;;  %p185_p8 = scmp.lt.u32.totalorder %s181_s8, %s255_s2 }
  0x40   :  { %p187_p9 = pnand %p185_p8, %p182_p7 }
  0x42   :  { %190 = shalt.err (!%p187_p9)
}
  0x43   :  { %s200_s13 = smov 256   ;;  %s201_s14 = smov 16  }
  0x44   :  { %105 = dma.vmem_to_hbm [thread:$0]  %s100_s4, 512, %s255_s2, [#allocation4], %s200_s13, %s200_s13, %s201_s14  }
  0x45   :  { %195 = dma.done.wait [#allocation4], 512  }
  0x46   :  { %196 = vsyncadd [#allocation4], 4294966784 }
  0x47   :  { %109 = vsyncpa [#allocation3], 1 }
  0x48   :  { %110 = vsyncpa [#allocation6], 1 }
  0x49   :  { %111 = vsyncpa [#allocation4], 1 }

</bundles_post_ra>
